<compile_context>
chip_gen: v6e
topology: v6e:2x2x1
jax: 0.10.0
libtpu: 0.0.40
codegen_flags: <defaults>
</compile_context>

<pallas_src>
import functools

import jax
import jax.numpy as jnp
from jax.experimental import pallas as pl
from jax.experimental.pallas import tpu as pltpu


def _choose_batch_tile(batch, target):
    """Largest tile <= target that is either the full batch or a multiple-of-8
    divisor of it (keeps BlockSpec sublane dims legal and the grid exact)."""
    if batch <= target:
        return batch
    upper = min(target, (batch // 8) * 8)
    for cand in range(upper, 7, -8):
        if batch % cand == 0:
            return cand
    return batch


# ----------------------------------------------------------------------------
# Kernel 1: fused part pooling (AdaptiveAvgPool2d((P,1))) + global pooling
# ----------------------------------------------------------------------------
def _pool_kernel(x_ref, out_ref, *, num_parts, rows_per_part):
    # x_ref:   (bt, H*W, C)  batch tile, spatial flattened on sublanes (any dtype)
    # out_ref: (P+1, bt, C)  head-major: rows 0..P-1 = part means, row P = global
    bt, hw, c = x_ref.shape
    x = x_ref[...].astype(jnp.float32)                      # f32 accumulation
    inv_rpp = 1.0 / float(rows_per_part)
    inv_hw = 1.0 / float(hw)
    total = jnp.zeros((bt, c), jnp.float32)
    for p in range(num_parts):                              # static unroll (P = 4)
        lo = p * rows_per_part
        psum = jnp.sum(x[:, lo:lo + rows_per_part, :], axis=1)   # (bt, C)
        out_ref[p, :, :] = (psum * inv_rpp).astype(out_ref.dtype)
        total = total + psum
    out_ref[num_parts, :, :] = (total * inv_hw).astype(out_ref.dtype)


def pcb_pool(x_bhwc, num_parts=4):
    """Returns pooled (P+1, B, C) f32: rows 0..P-1 part means, row P global mean."""
    B, H, W, C = x_bhwc.shape
    assert H % num_parts == 0, "uneven adaptive bins not supported"
    rows_per_part = (H // num_parts) * W
    hw = H * W
    x_flat = x_bhwc.reshape(B, hw, C)             # sublane-dense spatial axis
    # Multi-batch blocks; cap at 4 for 4-byte inputs so double-buffered tiles
    # stay well inside the 32 MiB scoped VMEM limit (v7x-safe).
    target_bt = 8 if x_bhwc.dtype.itemsize <= 2 else 4
    bt = _choose_batch_tile(B, target_bt)
    kernel = functools.partial(_pool_kernel, num_parts=num_parts,
                               rows_per_part=rows_per_part)
    return pl.pallas_call(
        kernel,
        out_shape=jax.ShapeDtypeStruct((num_parts + 1, B, C), jnp.float32),
        grid=(B // bt,),
        in_specs=[pl.BlockSpec((bt, hw, C), lambda b: (b, 0, 0))],
        out_specs=pl.BlockSpec((num_parts + 1, bt, C), lambda b: (0, b, 0)),
        compiler_params=pltpu.CompilerParams(
            dimension_semantics=("parallel",),
            vmem_limit_bytes=32 * 1024 * 1024),
    )(x_flat)


# ----------------------------------------------------------------------------
# Kernel 2: ClassBlock heads:
#   out = (x @ W1' + shift') @ W2 + b2        (W1' = W1*BNscale, bf16 weights)
#   One pallas_call per head family (parts / globe) so bottleneck widths are
#   never zero-padded to a common size.
# ----------------------------------------------------------------------------
def _classblock_kernel(x_ref, w1_ref, shift_ref, w2_ref, b2_ref, out_ref):
    # x_ref: (1,tb,C) f32   w1_ref: (1,C,Nb) bf16   shift_ref: (1,1,Nb) f32
    # w2_ref: (1,Nb,Kp) bf16   b2_ref: (1,1,Kp) f32   out_ref: (1,tb,Kp) f32
    x = x_ref[0].astype(jnp.bfloat16)
    # Linear bias + eval-mode BatchNorm1d already folded into W1/shift.
    h = jnp.dot(x, w1_ref[0], preferred_element_type=jnp.float32) + shift_ref[0]
    # Dropout(p=0.5): identity in eval mode.
    out_ref[0] = (jnp.dot(h.astype(jnp.bfloat16), w2_ref[0],
                          preferred_element_type=jnp.float32)
                  + b2_ref[0]).astype(out_ref.dtype)


def class_block_heads(x_hbc, w1, shift, w2, b2, *, num_heads, head_offset=0,
                      batch_tile=256):
    """Run `num_heads` ClassBlock heads sharing one bottleneck width.

    x_hbc : (H_any, B, C) head-major pooled features; heads
            [head_offset, head_offset+num_heads) are selected via the index_map
            (no wrapper slice / copy of the pooled tensor needed).
    Returns (num_heads, B, Kp) f32 logits, class dim still lane-padded.
    """
    _, B, C = x_hbc.shape
    Nb = w1.shape[-1]
    Kp = w2.shape[-1]
    tb = _choose_batch_tile(B, batch_tile)
    n_btiles = B // tb
    x_map = lambda h, b: (h + head_offset, b, 0)
    return pl.pallas_call(
        _classblock_kernel,
        out_shape=jax.ShapeDtypeStruct((num_heads, B, Kp), jnp.float32),
        grid=(num_heads, n_btiles),
        in_specs=[
            pl.BlockSpec((1, tb, C), x_map),
            # Weight index_maps ignore the batch axis -> each head's weights stay
            # VMEM-resident across consecutive batch tiles (no re-DMA).
            pl.BlockSpec((1, C, Nb), lambda h, b: (h, 0, 0)),
            pl.BlockSpec((1, 1, Nb), lambda h, b: (h, 0, 0)),
            pl.BlockSpec((1, Nb, Kp), lambda h, b: (h, 0, 0)),
            pl.BlockSpec((1, 1, Kp), lambda h, b: (h, 0, 0)),
        ],
        out_specs=pl.BlockSpec((1, tb, Kp), lambda h, b: (h, b, 0)),
        compiler_params=pltpu.CompilerParams(
            dimension_semantics=("parallel", "arbitrary"),
            vmem_limit_bytes=32 * 1024 * 1024),
    )(x_hbc, w1, shift.reshape(num_heads, 1, Nb), w2, b2.reshape(num_heads, 1, Kp))


# ----------------------------------------------------------------------------
# Parameter init (matches ClassBlock __init__ / weights_init_* semantics)
# ----------------------------------------------------------------------------
def init_classblock_params(key, num_heads, input_dim, num_bottleneck, class_num):
    k1, k2, k3 = jax.random.split(key, 3)
    # add_block Linear: kaiming_normal_, mode='fan_out' -> std = sqrt(2/out_features)
    w1 = jax.random.normal(k1, (num_heads, input_dim, num_bottleneck),
                           jnp.float32) * jnp.sqrt(2.0 / num_bottleneck)
    b1 = jnp.zeros((num_heads, num_bottleneck), jnp.float32)
    # BatchNorm1d: weight ~ N(1, 0.02), bias = 0, running stats (0, 1)
    gamma = 1.0 + 0.02 * jax.random.normal(k2, (num_heads, num_bottleneck), jnp.float32)
    beta = jnp.zeros((num_heads, num_bottleneck), jnp.float32)
    rmean = jnp.zeros((num_heads, num_bottleneck), jnp.float32)
    rvar = jnp.ones((num_heads, num_bottleneck), jnp.float32)
    # classifier Linear: weight ~ N(0, 0.001), bias = 0
    w2 = 0.001 * jax.random.normal(k3, (num_heads, num_bottleneck, class_num), jnp.float32)
    b2 = jnp.zeros((num_heads, class_num), jnp.float32)
    return dict(w1=w1, b1=b1, gamma=gamma, beta=beta,
                rmean=rmean, rvar=rvar, w2=w2, b2=b2)


def _fold_bn(p, eps=1e-5):
    """Fold Linear bias + eval-mode BatchNorm1d into (W1', shift'); bf16 W1."""
    scale = p["gamma"] / jnp.sqrt(p["rvar"] + eps)                     # (h, Nb)
    w1f = (p["w1"] * scale[:, None, :]).astype(jnp.bfloat16)           # (h, C, Nb)
    shift = (p["b1"] * scale + p["beta"] - p["rmean"] * scale).astype(jnp.float32)
    return w1f, shift


def _pad_classes(w2, b2, k_pad):
    """Lane-pad the class dim to a multiple of 128 (zero columns; exact)."""
    k = w2.shape[-1]
    w2p = jnp.pad(w2, ((0, 0), (0, 0), (0, k_pad - k))).astype(jnp.bfloat16)
    b2p = jnp.pad(b2, ((0, 0), (0, k_pad - k))).astype(jnp.float32)
    return w2p, b2p


def prepare_head_params(part_params, globe_params, eps=1e-5):
    """Two weight bundles (parts / globe) — NO bottleneck padding across them."""
    class_num = part_params["w2"].shape[-1]
    assert globe_params["w2"].shape[-1] == class_num
    k_pad = ((class_num + 127) // 128) * 128          # lane-dense output stores
    pw1, psh = _fold_bn(part_params, eps)
    gw1, gsh = _fold_bn(globe_params, eps)
    pw2, pb2 = _pad_classes(part_params["w2"], part_params["b2"], k_pad)
    gw2, gb2 = _pad_classes(globe_params["w2"], globe_params["b2"], k_pad)
    return dict(
        parts=dict(w1=pw1, shift=psh, w2=pw2, b2=pb2),    # (P, C, Nb_part) ...
        globe=dict(w1=gw1, shift=gsh, w2=gw2, b2=gb2),    # (1, C, Nb_globe) ...
        class_num=class_num,
        num_parts=part_params["w1"].shape[0],
    )


# ----------------------------------------------------------------------------
# PCB forward (post-backbone)
# ----------------------------------------------------------------------------
def pcb_forward(x_feat_bhwc, head_params):
    num_parts = head_params["num_parts"]
    class_num = head_params["class_num"]
    pooled = pcb_pool(x_feat_bhwc, num_parts)              # (P+1, B, C) f32 head-major

    pp, gp = head_params["parts"], head_params["globe"]
    # Separate calls for part heads vs globe head: no Nb zero-padding and better
    # megacore balance (2/2 part heads across v7x's two TensorCores).
    part_logits = class_block_heads(pooled, pp["w1"], pp["shift"], pp["w2"],
                                    pp["b2"], num_heads=num_parts)          # (P,B,Kp)
    globe_logits = class_block_heads(pooled, gp["w1"], gp["shift"], gp["w2"],
                                     gp["b2"], num_heads=1,
                                     head_offset=num_parts)                 # (1,B,Kp)

    feature_globe = pooled[num_parts]                       # (B, C)
    part = {i: pooled[i] for i in range(num_parts)}         # torch.squeeze(x[:, :, i])
    # Lane padding on the class dim is sliced off only here, at the consumer.
    y = [part_logits[i, :, :class_num] for i in range(num_parts)]
    globe_f = globe_logits[0, :, :class_num]
    return y, globe_f, part, feature_globe                  # covers train & eval returns


# ----------------------------------------------------------------------------
# Pure-JAX reference (same folded/bf16 math) for a sanity check
# ----------------------------------------------------------------------------
def _reference_forward(x_bhwc, part_params, globe_params, num_parts, eps=1e-5):
    B, H, W, C = x_bhwc.shape
    hp = H // num_parts
    xf = x_bhwc.astype(jnp.float32)
    parts = xf.reshape(B, num_parts, hp, W, C).mean(axis=(2, 3))  # (B, P, C)
    globe = xf.mean(axis=(1, 2))                                  # (B, C)

    def head(xin, p, i):
        scale = p["gamma"][i] / jnp.sqrt(p["rvar"][i] + eps)
        w1 = (p["w1"][i] * scale[None, :]).astype(jnp.bfloat16)
        shift = p["b1"][i] * scale + p["beta"][i] - p["rmean"][i] * scale
        w2 = p["w2"][i].astype(jnp.bfloat16)
        h = jnp.dot(xin.astype(jnp.bfloat16), w1,
                    preferred_element_type=jnp.float32) + shift
        return jnp.dot(h.astype(jnp.bfloat16), w2,
                       preferred_element_type=jnp.float32) + p["b2"][i]

    y_ref = [head(parts[:, i], part_params, i) for i in range(num_parts)]
    globe_ref = head(globe, globe_params, 0)
    return y_ref, globe_ref, parts, globe


if __name__ == "__main__":
    key = jax.random.PRNGKey(0)
    kx, kp, kg = jax.random.split(key, 3)

    # Small stand-ins: B=2, C=64 (for 2048), H=8 (4 parts of 2 rows), W=4,
    # bottleneck 32 (for 256, parts) / 64 (for 512, globe), 16 classes.
    B, H, W, C = 2, 8, 4, 64
    NUM_PARTS, NB_PART, NB_GLOBE, NUM_CLASSES = 4, 32, 64, 16

    # Feature map in bf16 (as a bf16 backbone would emit) — pool kernel
    # accumulates in f32 internally.
    x_feat = jax.random.normal(kx, (B, H, W, C), jnp.float32).astype(jnp.bfloat16)
    part_params = init_classblock_params(kp, NUM_PARTS, C, NB_PART, NUM_CLASSES)
    globe_params = init_classblock_params(kg, 1, C, NB_GLOBE, NUM_CLASSES)
    head_params = prepare_head_params(part_params, globe_params)

    y, globe_f, part, feature_globe = pcb_forward(x_feat, head_params)
    jax.block_until_ready((y, globe_f, part, feature_globe))

    assert len(y) == NUM_PARTS and y[0].shape == (B, NUM_CLASSES)
    assert globe_f.shape == (B, NUM_CLASSES)
    assert part[0].shape == (B, C) and feature_globe.shape == (B, C)

    # Numerical sanity check against a pure-JAX reference using identical
    # folded / bf16-quantized math.
    y_ref, globe_ref, parts_ref, globe_feat_ref = _reference_forward(
        x_feat, part_params, globe_params, NUM_PARTS)
    for i in range(NUM_PARTS):
        assert jnp.allclose(y[i], y_ref[i], rtol=2e-2, atol=1e-3), f"head {i} mismatch"
        assert jnp.allclose(part[i], parts_ref[:, i], rtol=1e-4, atol=1e-5)
    assert jnp.allclose(globe_f, globe_ref, rtol=2e-2, atol=1e-3)
    assert jnp.allclose(feature_globe, globe_feat_ref, rtol=1e-4, atol=1e-5)

    print("KERNEL_OK")
</pallas_src>

<mosaic_0001>
module attributes {stable_mosaic.version = 11 : i64} {
  func.func @_pool_kernel(%arg0: i32, %arg1: memref<2x32x64xbf16, #tpu.memory_space<vmem>>, %arg2: memref<5x2x64xf32, #tpu.memory_space<vmem>>) attributes {dimension_semantics = [#tpu.dimension_semantics<parallel>], iteration_bounds = array<i64: 1>, scalar_prefetch = 0 : i64, scratch_operands = 0 : i64, tpu.core_type = #tpu.core_type<tc>, window_params = [{transform_indices = @transform_0, window_bounds = array<i64: 2, 32, 64>}, {transform_indices = @transform_1, window_bounds = array<i64: 5, 2, 64>}]} {
    %c0 = arith.constant 0 : index
    %c0_0 = arith.constant 0 : index
    %c0_1 = arith.constant 0 : index
    %0 = vector.load %arg1[%c0, %c0_0, %c0_1] : memref<2x32x64xbf16, #tpu.memory_space<vmem>>, vector<2x32x64xbf16>
    %1 = arith.extf %0 : vector<2x32x64xbf16> to vector<2x32x64xf32>
    %cst = arith.constant 0.000000e+00 : f32
    %2 = vector.broadcast %cst : f32 to vector<2x64xf32>
    %3 = vector.extract_strided_slice %1 {offsets = [0, 0, 0], sizes = [2, 8, 64], strides = [1, 1, 1]} : vector<2x32x64xf32> to vector<2x8x64xf32>
    %cst_2 = arith.constant dense<0.000000e+00> : vector<2x64xf32>
    %4 = vector.multi_reduction <add>, %3, %cst_2 [1] : vector<2x8x64xf32> to vector<2x64xf32>
    %cst_3 = arith.constant 1.250000e-01 : f32
    %5 = vector.broadcast %cst_3 : f32 to vector<2x64xf32>
    %6 = arith.mulf %4, %5 : vector<2x64xf32>
    %c0_4 = arith.constant 0 : index
    %c0_5 = arith.constant 0 : index
    %c0_6 = arith.constant 0 : index
    %7 = vector.load %arg2[%c0_4, %c0_5, %c0_6] : memref<5x2x64xf32, #tpu.memory_space<vmem>>, vector<1x2x64xf32>
    %8 = vector.shape_cast %7 : vector<1x2x64xf32> to vector<2x64xf32>
    %9 = vector.shape_cast %6 : vector<2x64xf32> to vector<1x2x64xf32>
    tpu.vector_store %arg2[%c0_4, %c0_5, %c0_6], %9 {strides = array<i32>} : memref<5x2x64xf32, #tpu.memory_space<vmem>>, vector<1x2x64xf32>,
    %10 = arith.addf %2, %4 : vector<2x64xf32>
    %11 = vector.extract_strided_slice %1 {offsets = [0, 8, 0], sizes = [2, 8, 64], strides = [1, 1, 1]} : vector<2x32x64xf32> to vector<2x8x64xf32>
    %cst_7 = arith.constant dense<0.000000e+00> : vector<2x64xf32>
    %12 = vector.multi_reduction <add>, %11, %cst_7 [1] : vector<2x8x64xf32> to vector<2x64xf32>
    %cst_8 = arith.constant 1.250000e-01 : f32
    %13 = vector.broadcast %cst_8 : f32 to vector<2x64xf32>
    %14 = arith.mulf %12, %13 : vector<2x64xf32>
    %c1 = arith.constant 1 : index
    %c0_9 = arith.constant 0 : index
    %c0_10 = arith.constant 0 : index
    %15 = vector.load %arg2[%c1, %c0_9, %c0_10] : memref<5x2x64xf32, #tpu.memory_space<vmem>>, vector<1x2x64xf32>
    %16 = vector.shape_cast %15 : vector<1x2x64xf32> to vector<2x64xf32>
    %17 = vector.shape_cast %14 : vector<2x64xf32> to vector<1x2x64xf32>
    tpu.vector_store %arg2[%c1, %c0_9, %c0_10], %17 {strides = array<i32>} : memref<5x2x64xf32, #tpu.memory_space<vmem>>, vector<1x2x64xf32>,
    %18 = arith.addf %10, %12 : vector<2x64xf32>
    %19 = vector.extract_strided_slice %1 {offsets = [0, 16, 0], sizes = [2, 8, 64], strides = [1, 1, 1]} : vector<2x32x64xf32> to vector<2x8x64xf32>
    %cst_11 = arith.constant dense<0.000000e+00> : vector<2x64xf32>
    %20 = vector.multi_reduction <add>, %19, %cst_11 [1] : vector<2x8x64xf32> to vector<2x64xf32>
    %cst_12 = arith.constant 1.250000e-01 : f32
    %21 = vector.broadcast %cst_12 : f32 to vector<2x64xf32>
    %22 = arith.mulf %20, %21 : vector<2x64xf32>
    %c2 = arith.constant 2 : index
    %c0_13 = arith.constant 0 : index
    %c0_14 = arith.constant 0 : index
    %23 = vector.load %arg2[%c2, %c0_13, %c0_14] : memref<5x2x64xf32, #tpu.memory_space<vmem>>, vector<1x2x64xf32>
    %24 = vector.shape_cast %23 : vector<1x2x64xf32> to vector<2x64xf32>
    %25 = vector.shape_cast %22 : vector<2x64xf32> to vector<1x2x64xf32>
    tpu.vector_store %arg2[%c2, %c0_13, %c0_14], %25 {strides = array<i32>} : memref<5x2x64xf32, #tpu.memory_space<vmem>>, vector<1x2x64xf32>,
    %26 = arith.addf %18, %20 : vector<2x64xf32>
    %27 = vector.extract_strided_slice %1 {offsets = [0, 24, 0], sizes = [2, 8, 64], strides = [1, 1, 1]} : vector<2x32x64xf32> to vector<2x8x64xf32>
    %cst_15 = arith.constant dense<0.000000e+00> : vector<2x64xf32>
    %28 = vector.multi_reduction <add>, %27, %cst_15 [1] : vector<2x8x64xf32> to vector<2x64xf32>
    %cst_16 = arith.constant 1.250000e-01 : f32
    %29 = vector.broadcast %cst_16 : f32 to vector<2x64xf32>
    %30 = arith.mulf %28, %29 : vector<2x64xf32>
    %c3 = arith.constant 3 : index
    %c0_17 = arith.constant 0 : index
    %c0_18 = arith.constant 0 : index
    %31 = vector.load %arg2[%c3, %c0_17, %c0_18] : memref<5x2x64xf32, #tpu.memory_space<vmem>>, vector<1x2x64xf32>
    %32 = vector.shape_cast %31 : vector<1x2x64xf32> to vector<2x64xf32>
    %33 = vector.shape_cast %30 : vector<2x64xf32> to vector<1x2x64xf32>
    tpu.vector_store %arg2[%c3, %c0_17, %c0_18], %33 {strides = array<i32>} : memref<5x2x64xf32, #tpu.memory_space<vmem>>, vector<1x2x64xf32>,
    %34 = arith.addf %26, %28 : vector<2x64xf32>
    %cst_19 = arith.constant 3.125000e-02 : f32
    %35 = vector.broadcast %cst_19 : f32 to vector<2x64xf32>
    %36 = arith.mulf %34, %35 : vector<2x64xf32>
    %c4 = arith.constant 4 : index
    %c0_20 = arith.constant 0 : index
    %c0_21 = arith.constant 0 : index
    %37 = vector.load %arg2[%c4, %c0_20, %c0_21] : memref<5x2x64xf32, #tpu.memory_space<vmem>>, vector<1x2x64xf32>
    %38 = vector.shape_cast %37 : vector<1x2x64xf32> to vector<2x64xf32>
    %39 = vector.shape_cast %36 : vector<2x64xf32> to vector<1x2x64xf32>
    tpu.vector_store %arg2[%c4, %c0_20, %c0_21], %39 {strides = array<i32>} : memref<5x2x64xf32, #tpu.memory_space<vmem>>, vector<1x2x64xf32>,
    return
  }
  func.func @transform_0(%arg0: i32) -> (i32, i32, i32) {
    %c0_i32 = arith.constant 0 : i32
    %c0_i32_0 = arith.constant 0 : i32
    %c0_i32_1 = arith.constant 0 : i32
    return %arg0, %c0_i32, %c0_i32_0 : i32, i32, i32
  }
  func.func @transform_1(%arg0: i32) -> (i32, i32, i32) {
    %c0_i32 = arith.constant 0 : i32
    %c0_i32_0 = arith.constant 0 : i32
    %c0_i32_1 = arith.constant 0 : i32
    return %c0_i32, %arg0, %c0_i32_0 : i32, i32, i32
  }
}

</mosaic_0001>

<bundles_post_ra>
// kernel: tpu_custom_call.1
= control target key start
LH: loop header
LB: loop body
LE: loop exit
PB: predicated region body
PF: predicated region fallthrough
CT: control target
= control target key end

     0   :  { %6 = vsyncpa [#allocation3], 0  ;;  %s271_s0 = inlined_call_operand.hbm [shape: bf16[2,32,64], index: 0, kind: input, shape index: {}]   ;;  %s272_s1 = inlined_call_operand.hbm [shape: f32[5,2,64], index: 1, kind: output, shape index: {}]  }
   0x1   :  { %7 = vsyncpa [#allocation4], 0  ;;  %s231_s6 = smov [#allocation2]  }
   0x2   :  { %s13_s7 = sshll.u32 %s231_s6, 4  ;;  %s14_s7 = int_to_ptr.vmem [resolvable:$true] %s13_s7 }
   0x3   :  { %s195_s8 = scalar_lea.vmem %s14_s7, 512  ;;  %p200_p1 = scmp.lt.s32.totalorder %s14_s7, %s14_s7 }
   0x4   :  { %p196_p0 = scmp.ne.s32.totalorder %s14_s7, %s195_s8  ;;  %p201_p2 = scmp.lt.s32.totalorder %s195_s8, %s195_s8 }
   0x6   :  { %p202_p3 = por %p201_p2, %p200_p1 }
   0x8   :  { %p203_p4 = pnand %p202_p3, %p196_p0 }
   0xa   :  { %206 = shalt.err (!%p203_p4)
}
   0xb   :  { %s232_s9 = smov 64   ;;  %s233_s10 = smov 4  }
   0xc   :  { %19 = dma.hbm_to_vmem [thread:$0]  %s271_s0, 512, %s14_s7, [#allocation3], %s232_s9, %s232_s9, %s233_s10  }
   0xd   :  { %227 = dma.done.wait [#allocation3], 512  }
   0xe   :  { %228 = vsyncadd [#allocation3], 4294966784  ;;  %v163_v0 = vld [vmem:[#allocation2] sm:$0xff]   ;;  %v179_v1 = vld [vmem:[#allocation2 + $0x10] sm:$0xff]   ;;  %vm39_vm0 = vcmask 523264   ;;  %vm58_vm1 = vcmask 1041409  }
   0xf   :  { %v178_v2 = vld [vmem:[#allocation2 + $0x8] sm:$0xff]   ;;  %v164_v3 = vunpack.c.l.bf16 %v163_v0  ;;  %v172_v4 = vunpack.c.l.bf16 %v179_v1  ;;  %v165_v5 = vunpack.c.h.bf16 %v163_v0  ;;  %v173_v6 = vunpack.c.h.bf16 %v179_v1  ;;  %v180_v7 = vld [vmem:[#allocation2 + $0x18] sm:$0xff]   ;;  %s234_s0 = smov [#allocation5]  }
  0x10   :  { %v168_v8 = vunpack.c.l.bf16 %v178_v2  ;;  %v176_v9 = vunpack.c.l.bf16 %v180_v7  ;;  %v169_v10 = vunpack.c.h.bf16 %v178_v2  ;;  %v177_v11 = vunpack.c.h.bf16 %v180_v7  ;;  %s150_s13 = sshll.u32 %s234_s0, 4  ;;  %s151_s13 = int_to_ptr.vmem [resolvable:$true] %s150_s13 }
  0x11   :  { %v40_v12 = vsel %vm39_vm0, %v164_v3, 0.0  ;;  %v47_v13 = vsel %vm39_vm0, %v172_v4, 0.0  ;;  %v65_v14 = vsel %vm39_vm0, %v165_v5, 0.0  ;;  %v72_v15 = vsel %vm39_vm0, %v173_v6, 0.0  ;;  %s207_s14 = scalar_lea.vmem %s151_s13, 160  ;;  %p212_p6 = scmp.lt.s32.totalorder %s151_s13, %s151_s13 }
  0x12   :  { %v41_v16 = vrot.slane %v40_v12, 4  ;;  %v48_v17 = vrot.slane %v47_v13, 4  ;;  %v66_v18 = vrot.slane %v65_v14, 4  ;;  %v73_v19 = vrot.slane %v72_v15, 4  ;;  %p208_p5 = scmp.ne.s32.totalorder %s151_s13, %s207_s14  ;;  %p213_p7 = scmp.lt.s32.totalorder %s207_s14, %s207_s14 }
  0x13   :  { %v89_v20 = vsel %vm39_vm0, %v168_v8, 0.0  ;;  %v96_v21 = vsel %vm39_vm0, %v176_v9, 0.0  ;;  %v113_v22 = vsel %vm39_vm0, %v169_v10, 0.0  ;;  %v120_v23 = vsel %vm39_vm0, %v177_v11, 0.0 }
  0x14   :  { %v42_v24 = vadd.f32 %v41_v16, %v40_v12  ;;  %v49_v25 = vadd.f32 %v48_v17, %v47_v13  ;;  %v67_v26 = vadd.f32 %v66_v18, %v65_v14  ;;  %v74_v27 = vadd.f32 %v73_v19, %v72_v15  ;;  %p214_p8 = por %p213_p7, %p212_p6 }
  0x15   :  { %v90_v28 = vrot.slane %v89_v20, 4  ;;  %v97_v29 = vrot.slane %v96_v21, 4  ;;  %v114_v30 = vrot.slane %v113_v22, 4  ;;  %v121_v31 = vrot.slane %v120_v23, 4 }
  0x16   :  { %v43_v32 = vrot.slane %v42_v24, 2  ;;  %v50_v33 = vrot.slane %v49_v25, 2  ;;  %vm61_vm2 = vcmask 517120   ;;  %v68_v34 = vrot.slane %v67_v26, 2  ;;  %p215_p9 = pnand %p214_p8, %p208_p5 }
  0x17   :  { %v75_v35 = vrot.slane %v74_v27, 2  ;;  %v91_v36 = vadd.f32 %v90_v28, %v89_v20  ;;  %v98_v37 = vadd.f32 %v97_v29, %v96_v21  ;;  %v115_v38 = vadd.f32 %v114_v30, %v113_v22 }
  0x18   :  { %v122_v39 = vadd.f32 %v121_v31, %v120_v23  ;;  %v44_v40 = vadd.f32 %v43_v32, %v42_v24  ;;  %v51_v41 = vadd.f32 %v50_v33, %v49_v25  ;;  %v69_v42 = vadd.f32 %v68_v34, %v67_v26 }
  0x19   :  { %v76_v43 = vadd.f32 %v75_v35, %v74_v27  ;;  %v92_v44 = vrot.slane %v91_v36, 2  ;;  %v99_v45 = vrot.slane %v98_v37, 2  ;;  %v116_v46 = vrot.slane %v115_v38, 2 }
  0x1a   :  { %v123_v47 = vrot.slane %v122_v39, 2  ;;  %v45_v48 = vrot.slane %v44_v40, 1  ;;  %v52_v49 = vrot.slane %v51_v41, 1  ;;  %v70_v50 = vrot.slane %v69_v42, 1 }
  0x1b   :  { %v77_v51 = vrot.slane %v76_v43, 1  ;;  %v93_v52 = vadd.f32 %v92_v44, %v91_v36  ;;  %v100_v53 = vadd.f32 %v99_v45, %v98_v37  ;;  %v117_v54 = vadd.f32 %v116_v46, %v115_v38 }
  0x1c   :  { %v124_v55 = vadd.f32 %v123_v47, %v122_v39  ;;  %v46_v56 = vadd.f32 %v45_v48, %v44_v40  ;;  %v53_v57 = vadd.f32 %v52_v49, %v51_v41  ;;  %v71_v58 = vadd.f32 %v70_v50, %v69_v42 }
  0x1d   :  { %v78_v59 = vadd.f32 %v77_v51, %v76_v43  ;;  %v94_v60 = vrot.slane %v93_v52, 1  ;;  %v101_v61 = vrot.slane %v100_v53, 1  ;;  %v118_v62 = vrot.slane %v117_v54, 1 }
  0x1e   :  { %v125_v63 = vrot.slane %v124_v55, 1  ;;  %v54_v0 = vmul.f32 0.125, %v46_v56  ;;  %v55_v1 = vmul.f32 0.125, %v53_v57  ;;  %v79_v2 = vmul.f32 0.125, %v71_v58 }
  0x1f   :  { %v80_v3 = vmul.f32 0.125, %v78_v59  ;;  %v87_v4 = vadd.f32 %v71_v58, %v46_v56  ;;  %v88_v5 = vadd.f32 %v78_v59, %v53_v57  ;;  %v95_v6 = vadd.f32 %v94_v60, %v93_v52 }
  0x20   :  { %v102_v7 = vadd.f32 %v101_v61, %v100_v53  ;;  %v59_v8 = vsel %vm58_vm1, %v55_v1, %v54_v0  ;;  %v119_v10 = vadd.f32 %v118_v62, %v117_v54  ;;  %v126_v11 = vadd.f32 %v125_v63, %v124_v55 }
  0x21   :  { %v83_v9 = vsel %vm58_vm1, %v80_v3, %v79_v2  ;;  %62 = vst.msk [vmem:[#allocation5] sm:$0x3] %vm61_vm2, %v59_v8  ;;  %v103_v12 = vmul.f32 0.125, %v95_v6  ;;  %v111_v14 = vadd.f32 %v95_v6, %v87_v4 }
  0x22   :  { %86 = vst.msk [vmem:[#allocation5 + $0x2] sm:$0x3] %vm61_vm2, %v83_v9  ;;  %v104_v13 = vmul.f32 0.125, %v102_v7  ;;  %v112_v15 = vadd.f32 %v102_v7, %v88_v5  ;;  %v127_v16 = vmul.f32 0.125, %v119_v10  ;;  %v128_v17 = vmul.f32 0.125, %v126_v11 }
  0x23   :  { %v135_v19 = vadd.f32 %v119_v10, %v111_v14 }
  0x24   :  { %v107_v18 = vsel %vm58_vm1, %v104_v13, %v103_v12  ;;  %v136_v20 = vadd.f32 %v126_v11, %v112_v15  ;;  %v131_v21 = vsel %vm58_vm1, %v128_v17, %v127_v16 }
  0x25   :  { %110 = vst.msk [vmem:[#allocation5 + $0x4] sm:$0x3] %vm61_vm2, %v107_v18  ;;  %134 = vst.msk [vmem:[#allocation5 + $0x6] sm:$0x3] %vm61_vm2, %v131_v21  ;;  %v137_v22 = vmul.f32 0.03125, %v135_v19 }
  0x26   :  { %v138_v23 = vmul.f32 0.03125, %v136_v20 }
  0x28   :  { %v141_v24 = vsel %vm58_vm1, %v138_v23, %v137_v22 }
  0x29   :  { %144 = vst.msk [vmem:[#allocation5 + $0x8] sm:$0x3] %vm61_vm2, %v141_v24 }
  0x2a   :  { %218 = shalt.err (!%p215_p9)
}
  0x2b   :  { %s235_s15 = smov 32   ;;  %s236_s16 = smov 2  }
  0x2c   :  { %156 = dma.vmem_to_hbm [thread:$0]  %s151_s13, 160, %s272_s1, [#allocation4], %s235_s15, %s235_s15, %s236_s16  }
  0x2d   :  { %229 = dma.done.wait [#allocation4], 160  }
  0x2e   :  { %230 = vsyncadd [#allocation4], 4294967136 }
  0x2f   :  { %160 = vsyncpa [#allocation3], 1 }
  0x30   :  { %161 = vsyncpa [#allocation4], 1 }

</bundles_post_ra>
